<compile_context>
chip_gen: v6e
topology: v6e:2x2x1
jax: 0.10.0
libtpu: 0.0.40
codegen_flags: <defaults>
</compile_context>

<pallas_src>
import functools

import jax
import jax.numpy as jnp
from jax import lax
from jax.experimental import pallas as pl
from jax.experimental.pallas import tpu as pltpu


def _dwconv_bn_kernel(x_e_ref, x_o_ref, w_ref, gamma_ref, beta_ref, o_ref,
                      sum_ref, ssq_ref, cre_ref, cro_ref, *, eps, th):
    """Refs (per grid step t):
       x_e_ref: (2*TH, We8, Cp) even padded columns of padded rows [2*TH*t+1, 2*TH*(t+1)]
       x_o_ref: (2*TH, We8, Cp) odd  padded columns of the same rows
       w_ref:   (9, Cp)         depthwise weights, row k = (kh, kw) = (k//3, k%3)
       gamma_ref, beta_ref: (1, Cp)
       o_ref:   (H_out, W_out, Cp) resident output block (raw conv, then normalized)
       sum_ref, ssq_ref: (W_out, Cp) full-width batch-stat partials (VMEM scratch)
       cre_ref, cro_ref: (We8, Cp)  carried even padded row (kh=0 row of the next tile)
    """
    t = pl.program_id(0)
    nt = pl.num_programs(0)
    h_out, w_out, cp = o_ref.shape

    @pl.when(t == 0)
    def _init():
        sum_ref[...] = jnp.zeros_like(sum_ref)
        ssq_ref[...] = jnp.zeros_like(ssq_ref)
        cre_ref[...] = jnp.zeros_like(cre_ref)   # top conv-padding row (all zeros)
        cro_ref[...] = jnp.zeros_like(cro_ref)

    # Hoist the 9 depthwise weight rows once per grid step (sublane-replicated (1, Cp)).
    w_t = [w_ref[k:k + 1, :] for k in range(9)]

    def add_taps(acc, e_tap0, o_tap1, e_tap2, kh):
        acc = acc + e_tap0 * w_t[3 * kh + 0]      # kw = 0 (even padded columns)
        acc = acc + o_tap1 * w_t[3 * kh + 1]      # kw = 1 (odd padded columns)
        acc = acc + e_tap2 * w_t[3 * kh + 2]      # kw = 2 (even padded columns, +1)
        return acc

    base = t * th

    # ---- peeled first output row of the tile: its kh=0 row is the carried row ----
    acc = jnp.zeros((w_out, cp), jnp.float32)
    acc = add_taps(acc, cre_ref[0:w_out, :], cro_ref[0:w_out, :],
                   cre_ref[1:w_out + 1, :], 0)
    acc = add_taps(acc, x_e_ref[0, 0:w_out, :], x_o_ref[0, 0:w_out, :],
                   x_e_ref[0, 1:w_out + 1, :], 1)
    acc = add_taps(acc, x_e_ref[1, 0:w_out, :], x_o_ref[1, 0:w_out, :],
                   x_e_ref[1, 1:w_out + 1, :], 2)
    o_ref[base] = acc
    s0 = acc
    q0 = acc * acc

    # ---- remaining TH-1 output rows of the tile ----
    def row_body(oh, carry):
        s_loc, q_loc = carry
        r = 2 * oh
        a = jnp.zeros((w_out, cp), jnp.float32)
        a = add_taps(a, x_e_ref[r - 1, 0:w_out, :], x_o_ref[r - 1, 0:w_out, :],
                     x_e_ref[r - 1, 1:w_out + 1, :], 0)
        a = add_taps(a, x_e_ref[r, 0:w_out, :], x_o_ref[r, 0:w_out, :],
                     x_e_ref[r, 1:w_out + 1, :], 1)
        a = add_taps(a, x_e_ref[r + 1, 0:w_out, :], x_o_ref[r + 1, 0:w_out, :],
                     x_e_ref[r + 1, 1:w_out + 1, :], 2)
        o_ref[base + oh] = a                      # raw conv row, stays in VMEM
        return s_loc + a, q_loc + a * a           # full-width partials (VALU only)

    s_loc, q_loc = lax.fori_loop(1, th, row_body, (s0, q0), unroll=(th <= 4))

    sum_ref[...] = sum_ref[...] + s_loc
    ssq_ref[...] = ssq_ref[...] + q_loc

    # Carry this tile's last (even) padded row -> kh=0 row of the next tile's first row.
    cre_ref[...] = x_e_ref[2 * th - 1]
    cro_ref[...] = x_o_ref[2 * th - 1]

    @pl.when(t == nt - 1)
    def _finalize():
        inv_n = 1.0 / float(h_out * w_out)        # N == 1 -> stats over H_out*W_out
        mean = jnp.sum(sum_ref[...], axis=0, keepdims=True) * inv_n       # (1, Cp)
        ex2 = jnp.sum(ssq_ref[...], axis=0, keepdims=True) * inv_n
        # TODO(synk): E[x^2]-E[x]^2 (clamped) is slightly less stable than two-pass
        # variance for large-magnitude activations.
        var = jnp.maximum(ex2 - mean * mean, 0.0)
        scale = gamma_ref[...] * lax.rsqrt(var + eps)                     # (1, Cp)
        shift = beta_ref[...] - mean * scale
        o_ref[...] = o_ref[...] * scale + shift   # single elementwise pass over block


def dwconv3x3s2_batchnorm(x_nchw, weight_oihw, gamma, beta, eps=1e-5):
    """Pallas implementation of M.forward: Conv2d(C, C, 3, stride=2, pad=1, groups=C,
    bias=False) followed by BatchNorm2d(C) in training mode (batch statistics).
    Input / weights follow PyTorch NCHW / OIHW layouts."""
    N, C, H, W = x_nchw.shape
    assert N == 1, "module forward is defined for batch size 1"
    H_out = (H - 1) // 2 + 1
    W_out = (W - 1) // 2 + 1

    Cp = ((C + 127) // 128) * 128                 # full lane width (96 -> 128)
    We8 = ((W_out + 1 + 7) // 8) * 8              # sublane-aligned even/odd plane width

    # Output-row tile: largest divisor of H_out that (a) keeps >= 2 grid steps so the
    # input DMA pipelines, and (b) keeps the per-plane block around <= 2 MiB.
    th_cap = max(1, min(32, H_out // 2, (2 << 20) // max(1, 8 * We8 * Cp)))
    TH = 1
    for cand in range(th_cap, 0, -1):
        if H_out % cand == 0:
            TH = cand
            break
    nt = H_out // TH

    # NCHW -> HWC, one zero pad (top/left conv pad, bottom/right reach, lane pad C->Cp),
    # then split into even/odd padded-column planes.  Padded row 0 (top conv pad) is
    # dropped; the kernel supplies it via the zero-initialized carry scratch.
    x_hwc = jnp.transpose(x_nchw[0], (1, 2, 0)).astype(jnp.float32)
    x_pad = jnp.pad(x_hwc, ((1, 2 * H_out - H), (1, 2 * We8 - 1 - W), (0, Cp - C)))
    x_pad = x_pad[1:]                             # rows now = padded rows 1 .. 2*H_out
    x_e = x_pad[:, 0::2, :]                       # (2*H_out, We8, Cp)  kw = 0 / 2 taps
    x_o = x_pad[:, 1::2, :]                       # (2*H_out, We8, Cp)  kw = 1 taps

    # OIHW depthwise weights (C, 1, 3, 3) -> (9, Cp), row k = (kh, kw)
    w = jnp.transpose(weight_oihw[:, 0, :, :], (1, 2, 0)).reshape(9, C)
    w = jnp.pad(w.astype(jnp.float32), ((0, 0), (0, Cp - C)))
    gamma_p = jnp.pad(gamma.astype(jnp.float32), (0, Cp - C)).reshape(1, Cp)
    beta_p = jnp.pad(beta.astype(jnp.float32), (0, Cp - C)).reshape(1, Cp)

    out_hwc = pl.pallas_call(
        functools.partial(_dwconv_bn_kernel, eps=float(eps), th=TH),
        out_shape=jax.ShapeDtypeStruct((H_out, W_out, Cp), jnp.float32),
        grid=(nt,),
        in_specs=[
            # 2*TH padded rows of each column-parity plane, double-buffered by Pallas
            pl.BlockSpec((2 * TH, We8, Cp), lambda t: (t, 0, 0)),   # even columns
            pl.BlockSpec((2 * TH, We8, Cp), lambda t: (t, 0, 0)),   # odd columns
            pl.BlockSpec((9, Cp), lambda t: (0, 0)),                # weights (resident)
            pl.BlockSpec((1, Cp), lambda t: (0, 0)),                # gamma
            pl.BlockSpec((1, Cp), lambda t: (0, 0)),                # beta
        ],
        # constant index map => output block stays resident in VMEM across the grid
        out_specs=pl.BlockSpec((H_out, W_out, Cp), lambda t: (0, 0, 0)),
        scratch_shapes=[
            pltpu.VMEM((W_out, Cp), jnp.float32),   # per-column running sum
            pltpu.VMEM((W_out, Cp), jnp.float32),   # per-column running sum of squares
            pltpu.VMEM((We8, Cp), jnp.float32),     # carried even-column padded row
            pltpu.VMEM((We8, Cp), jnp.float32),     # carried odd-column padded row
        ],
        compiler_params=pltpu.CompilerParams(
            dimension_semantics=("arbitrary",),     # resident output + carries + stats
            vmem_limit_bytes=32 * 1024 * 1024),
    )(x_e, x_o, w, gamma_p, beta_p)

    # strip lane padding, back to NCHW for the PyTorch-shaped interface
    return jnp.transpose(out_hwc[:, :, :C], (2, 0, 1))[None]


def _reference(x, w, gamma, beta, eps):
    """Plain-JAX reference mirroring the PyTorch module (training-mode BN)."""
    y = lax.conv_general_dilated(
        x, w, window_strides=(2, 2), padding=((1, 1), (1, 1)),
        dimension_numbers=("NCHW", "OIHW", "NCHW"),
        feature_group_count=x.shape[1],
        precision=lax.Precision.HIGHEST)
    mean = jnp.mean(y, axis=(0, 2, 3), keepdims=True)
    var = jnp.mean((y - mean) ** 2, axis=(0, 2, 3), keepdims=True)
    g = gamma.reshape(1, -1, 1, 1)
    b = beta.reshape(1, -1, 1, 1)
    return (y - mean) * (g / jnp.sqrt(var + eps)) + b


if __name__ == "__main__":
    key = jax.random.PRNGKey(0)
    kx, kw, kg, kb = jax.random.split(key, 4)
    C = 96                                   # fixed by the module definition
    H = W = 32                               # small spatial size (module uses 112)

    x = jax.random.normal(kx, (1, C, H, W), dtype=jnp.float32)
    weight = jax.random.normal(kw, (C, 1, 3, 3), dtype=jnp.float32) * 0.1
    gamma = 1.0 + 0.1 * jax.random.normal(kg, (C,), dtype=jnp.float32)
    beta = 0.1 * jax.random.normal(kb, (C,), dtype=jnp.float32)

    out = dwconv3x3s2_batchnorm(x, weight, gamma, beta)
    out = jax.block_until_ready(out)
    assert out.shape == (1, C, H // 2, W // 2)

    ref = _reference(x, weight, gamma, beta, 1e-5)
    if not jnp.allclose(out, ref, atol=2e-4, rtol=2e-4):
        raise AssertionError(
            f"mismatch vs reference, max abs err = {float(jnp.max(jnp.abs(out - ref)))}")
    print("KERNEL_OK")
</pallas_src>

<mosaic_0001>
module attributes {stable_mosaic.version = 11 : i64} {
  func.func @_dwconv_bn_kernel(%arg0: i32, %arg1: memref<16x24x128xf32, #tpu.memory_space<vmem>>, %arg2: memref<16x24x128xf32, #tpu.memory_space<vmem>>, %arg3: memref<9x128xf32, #tpu.memory_space<vmem>>, %arg4: memref<1x128xf32, #tpu.memory_space<vmem>>, %arg5: memref<1x128xf32, #tpu.memory_space<vmem>>, %arg6: memref<16x16x128xf32, #tpu.memory_space<vmem>>, %arg7: memref<16x128xf32, #tpu.memory_space<vmem>>, %arg8: memref<16x128xf32, #tpu.memory_space<vmem>>, %arg9: memref<24x128xf32, #tpu.memory_space<vmem>>, %arg10: memref<24x128xf32, #tpu.memory_space<vmem>>) attributes {dimension_semantics = [#tpu.dimension_semantics<arbitrary>], iteration_bounds = array<i64: 2>, scalar_prefetch = 0 : i64, scratch_operands = 4 : i64, tpu.core_type = #tpu.core_type<tc>, window_params = [{transform_indices = @transform_0, window_bounds = array<i64: 16, 24, 128>}, {transform_indices = @transform_1, window_bounds = array<i64: 16, 24, 128>}, {pipeline_mode = #tpu.pipeline_mode<synchronous>, transform_indices = @transform_2, window_bounds = array<i64: 9, 128>}, {pipeline_mode = #tpu.pipeline_mode<synchronous>, transform_indices = @transform_3, window_bounds = array<i64: 1, 128>}, {pipeline_mode = #tpu.pipeline_mode<synchronous>, transform_indices = @transform_4, window_bounds = array<i64: 1, 128>}, {pipeline_mode = #tpu.pipeline_mode<synchronous>, transform_indices = @transform_5, window_bounds = array<i64: 16, 16, 128>}]} {
    %c0_i32 = arith.constant 0 : i32
    %0 = arith.cmpi eq, %arg0, %c0_i32 : i32
    %1 = arith.extui %0 : i1 to i32
    %c0_i32_0 = arith.constant 0 : i32
    %2 = arith.cmpi ne, %1, %c0_i32_0 : i32
    scf.if %2 {
      %cst_57 = arith.constant 0.000000e+00 : f32
      %78 = vector.broadcast %cst_57 : f32 to vector<16x128xf32>
      %c0_58 = arith.constant 0 : index
      %c0_59 = arith.constant 0 : index
      %79 = vector.load %arg7[%c0_58, %c0_59] : memref<16x128xf32, #tpu.memory_space<vmem>>, vector<16x128xf32>
      tpu.vector_store %arg7[%c0_58, %c0_59], %78 {strides = array<i32>} : memref<16x128xf32, #tpu.memory_space<vmem>>, vector<16x128xf32>,
      %cst_60 = arith.constant 0.000000e+00 : f32
      %80 = vector.broadcast %cst_60 : f32 to vector<16x128xf32>
      %c0_61 = arith.constant 0 : index
      %c0_62 = arith.constant 0 : index
      %81 = vector.load %arg8[%c0_61, %c0_62] : memref<16x128xf32, #tpu.memory_space<vmem>>, vector<16x128xf32>
      tpu.vector_store %arg8[%c0_61, %c0_62], %80 {strides = array<i32>} : memref<16x128xf32, #tpu.memory_space<vmem>>, vector<16x128xf32>,
      %cst_63 = arith.constant 0.000000e+00 : f32
      %82 = vector.broadcast %cst_63 : f32 to vector<24x128xf32>
      %c0_64 = arith.constant 0 : index
      %c0_65 = arith.constant 0 : index
      %83 = vector.load %arg9[%c0_64, %c0_65] : memref<24x128xf32, #tpu.memory_space<vmem>>, vector<24x128xf32>
      tpu.vector_store %arg9[%c0_64, %c0_65], %82 {strides = array<i32>} : memref<24x128xf32, #tpu.memory_space<vmem>>, vector<24x128xf32>,
      %cst_66 = arith.constant 0.000000e+00 : f32
      %84 = vector.broadcast %cst_66 : f32 to vector<24x128xf32>
      %c0_67 = arith.constant 0 : index
      %c0_68 = arith.constant 0 : index
      %85 = vector.load %arg10[%c0_67, %c0_68] : memref<24x128xf32, #tpu.memory_space<vmem>>, vector<24x128xf32>
      tpu.vector_store %arg10[%c0_67, %c0_68], %84 {strides = array<i32>} : memref<24x128xf32, #tpu.memory_space<vmem>>, vector<24x128xf32>,
    } else {
    }
    %c0 = arith.constant 0 : index
    %c0_1 = arith.constant 0 : index
    %3 = vector.load %arg3[%c0, %c0_1] : memref<9x128xf32, #tpu.memory_space<vmem>>, vector<1x128xf32>
    %c1 = arith.constant 1 : index
    %c0_2 = arith.constant 0 : index
    %4 = vector.load %arg3[%c1, %c0_2] : memref<9x128xf32, #tpu.memory_space<vmem>>, vector<1x128xf32>
    %c2 = arith.constant 2 : index
    %c0_3 = arith.constant 0 : index
    %5 = vector.load %arg3[%c2, %c0_3] : memref<9x128xf32, #tpu.memory_space<vmem>>, vector<1x128xf32>
    %c3 = arith.constant 3 : index
    %c0_4 = arith.constant 0 : index
    %6 = vector.load %arg3[%c3, %c0_4] : memref<9x128xf32, #tpu.memory_space<vmem>>, vector<1x128xf32>
    %c4 = arith.constant 4 : index
    %c0_5 = arith.constant 0 : index
    %7 = vector.load %arg3[%c4, %c0_5] : memref<9x128xf32, #tpu.memory_space<vmem>>, vector<1x128xf32>
    %c5 = arith.constant 5 : index
    %c0_6 = arith.constant 0 : index
    %8 = vector.load %arg3[%c5, %c0_6] : memref<9x128xf32, #tpu.memory_space<vmem>>, vector<1x128xf32>
    %c6 = arith.constant 6 : index
    %c0_7 = arith.constant 0 : index
    %9 = vector.load %arg3[%c6, %c0_7] : memref<9x128xf32, #tpu.memory_space<vmem>>, vector<1x128xf32>
    %c7 = arith.constant 7 : index
    %c0_8 = arith.constant 0 : index
    %10 = vector.load %arg3[%c7, %c0_8] : memref<9x128xf32, #tpu.memory_space<vmem>>, vector<1x128xf32>
    %c8 = arith.constant 8 : index
    %c0_9 = arith.constant 0 : index
    %11 = vector.load %arg3[%c8, %c0_9] : memref<9x128xf32, #tpu.memory_space<vmem>>, vector<1x128xf32>
    %c8_i32 = arith.constant 8 : i32
    %12 = arith.muli %arg0, %c8_i32 : i32
    %cst = arith.constant 0.000000e+00 : f32
    %13 = vector.broadcast %cst : f32 to vector<16x128xf32>
    %c0_10 = arith.constant 0 : index
    %c0_11 = arith.constant 0 : index
    %14 = vector.load %arg9[%c0_10, %c0_11] : memref<24x128xf32, #tpu.memory_space<vmem>>, vector<16x128xf32>
    %c0_12 = arith.constant 0 : index
    %c0_13 = arith.constant 0 : index
    %15 = vector.load %arg10[%c0_12, %c0_13] : memref<24x128xf32, #tpu.memory_space<vmem>>, vector<16x128xf32>
    %c1_14 = arith.constant 1 : index
    %c0_15 = arith.constant 0 : index
    %16 = vector.load %arg9[%c1_14, %c0_15] : memref<24x128xf32, #tpu.memory_space<vmem>>, vector<16x128xf32>
    %17 = vector.broadcast %3 : vector<1x128xf32> to vector<16x128xf32>
    %18 = arith.mulf %14, %17 : vector<16x128xf32>
    %19 = arith.addf %13, %18 : vector<16x128xf32>
    %20 = vector.broadcast %4 : vector<1x128xf32> to vector<16x128xf32>
    %21 = arith.mulf %15, %20 : vector<16x128xf32>
    %22 = arith.addf %19, %21 : vector<16x128xf32>
    %23 = vector.broadcast %5 : vector<1x128xf32> to vector<16x128xf32>
    %24 = arith.mulf %16, %23 : vector<16x128xf32>
    %25 = arith.addf %22, %24 : vector<16x128xf32>
    %c0_16 = arith.constant 0 : index
    %c0_17 = arith.constant 0 : index
    %c0_18 = arith.constant 0 : index
    %26 = vector.load %arg1[%c0_16, %c0_17, %c0_18] : memref<16x24x128xf32, #tpu.memory_space<vmem>>, vector<1x16x128xf32>
    %27 = vector.shape_cast %26 : vector<1x16x128xf32> to vector<16x128xf32>
    %c0_19 = arith.constant 0 : index
    %c0_20 = arith.constant 0 : index
    %c0_21 = arith.constant 0 : index
    %28 = vector.load %arg2[%c0_19, %c0_20, %c0_21] : memref<16x24x128xf32, #tpu.memory_space<vmem>>, vector<1x16x128xf32>
    %29 = vector.shape_cast %28 : vector<1x16x128xf32> to vector<16x128xf32>
    %c0_22 = arith.constant 0 : index
    %c1_23 = arith.constant 1 : index
    %c0_24 = arith.constant 0 : index
    %30 = vector.load %arg1[%c0_22, %c1_23, %c0_24] : memref<16x24x128xf32, #tpu.memory_space<vmem>>, vector<1x16x128xf32>
    %31 = vector.shape_cast %30 : vector<1x16x128xf32> to vector<16x128xf32>
    %32 = vector.broadcast %6 : vector<1x128xf32> to vector<16x128xf32>
    %33 = arith.mulf %27, %32 : vector<16x128xf32>
    %34 = arith.addf %25, %33 : vector<16x128xf32>
    %35 = vector.broadcast %7 : vector<1x128xf32> to vector<16x128xf32>
    %36 = arith.mulf %29, %35 : vector<16x128xf32>
    %37 = arith.addf %34, %36 : vector<16x128xf32>
    %38 = vector.broadcast %8 : vector<1x128xf32> to vector<16x128xf32>
    %39 = arith.mulf %31, %38 : vector<16x128xf32>
    %40 = arith.addf %37, %39 : vector<16x128xf32>
    %c1_25 = arith.constant 1 : index
    %c0_26 = arith.constant 0 : index
    %c0_27 = arith.constant 0 : index
    %41 = vector.load %arg1[%c1_25, %c0_26, %c0_27] : memref<16x24x128xf32, #tpu.memory_space<vmem>>, vector<1x16x128xf32>
    %42 = vector.shape_cast %41 : vector<1x16x128xf32> to vector<16x128xf32>
    %c1_28 = arith.constant 1 : index
    %c0_29 = arith.constant 0 : index
    %c0_30 = arith.constant 0 : index
    %43 = vector.load %arg2[%c1_28, %c0_29, %c0_30] : memref<16x24x128xf32, #tpu.memory_space<vmem>>, vector<1x16x128xf32>
    %44 = vector.shape_cast %43 : vector<1x16x128xf32> to vector<16x128xf32>
    %c1_31 = arith.constant 1 : index
    %c1_32 = arith.constant 1 : index
    %c0_33 = arith.constant 0 : index
    %45 = vector.load %arg1[%c1_31, %c1_32, %c0_33] : memref<16x24x128xf32, #tpu.memory_space<vmem>>, vector<1x16x128xf32>
    %46 = vector.shape_cast %45 : vector<1x16x128xf32> to vector<16x128xf32>
    %47 = vector.broadcast %9 : vector<1x128xf32> to vector<16x128xf32>
    %48 = arith.mulf %42, %47 : vector<16x128xf32>
    %49 = arith.addf %40, %48 : vector<16x128xf32>
    %50 = vector.broadcast %10 : vector<1x128xf32> to vector<16x128xf32>
    %51 = arith.mulf %44, %50 : vector<16x128xf32>
    %52 = arith.addf %49, %51 : vector<16x128xf32>
    %53 = vector.broadcast %11 : vector<1x128xf32> to vector<16x128xf32>
    %54 = arith.mulf %46, %53 : vector<16x128xf32>
    %55 = arith.addf %52, %54 : vector<16x128xf32>
    %56 = arith.index_cast %12 : i32 to index
    %c0_34 = arith.constant 0 : index
    %c0_35 = arith.constant 0 : index
    %57 = vector.load %arg6[%56, %c0_34, %c0_35] : memref<16x16x128xf32, #tpu.memory_space<vmem>>, vector<1x16x128xf32>
    %58 = vector.shape_cast %57 : vector<1x16x128xf32> to vector<16x128xf32>
    %59 = vector.shape_cast %55 : vector<16x128xf32> to vector<1x16x128xf32>
    tpu.vector_store %arg6[%56, %c0_34, %c0_35], %59 {strides = array<i32>} : memref<16x16x128xf32, #tpu.memory_space<vmem>>, vector<1x16x128xf32>,
    %60 = arith.mulf %55, %55 : vector<16x128xf32>
    %c1_i32 = arith.constant 1 : i32
    %c7_i32 = arith.constant 7 : i32
    %61 = arith.addi %c1_i32, %c7_i32 : i32
    %c1_i32_36 = arith.constant 1 : i32
    %62:2 = scf.for %arg11 = %c1_i32 to %61 step %c1_i32_36 iter_args(%arg12 = %55, %arg13 = %60) -> (vector<16x128xf32>, vector<16x128xf32>)  : i32 {
      %c2_i32 = arith.constant 2 : i32
      %78 = arith.muli %c2_i32, %arg11 : i32
      %cst_57 = arith.constant 0.000000e+00 : f32
      %79 = vector.broadcast %cst_57 : f32 to vector<16x128xf32>
      %c1_i32_58 = arith.constant 1 : i32
      %80 = arith.subi %78, %c1_i32_58 : i32
      %81 = arith.index_cast %80 : i32 to index
      %c0_59 = arith.constant 0 : index
      %c0_60 = arith.constant 0 : index
      %82 = vector.load %arg1[%81, %c0_59, %c0_60] : memref<16x24x128xf32, #tpu.memory_space<vmem>>, vector<1x16x128xf32>
      %83 = vector.shape_cast %82 : vector<1x16x128xf32> to vector<16x128xf32>
      %c1_i32_61 = arith.constant 1 : i32
      %84 = arith.subi %78, %c1_i32_61 : i32
      %85 = arith.index_cast %84 : i32 to index
      %c0_62 = arith.constant 0 : index
      %c0_63 = arith.constant 0 : index
      %86 = vector.load %arg2[%85, %c0_62, %c0_63] : memref<16x24x128xf32, #tpu.memory_space<vmem>>, vector<1x16x128xf32>
      %87 = vector.shape_cast %86 : vector<1x16x128xf32> to vector<16x128xf32>
      %c1_i32_64 = arith.constant 1 : i32
      %88 = arith.subi %78, %c1_i32_64 : i32
      %89 = arith.index_cast %88 : i32 to index
      %c1_65 = arith.constant 1 : index
      %c0_66 = arith.constant 0 : index
      %90 = vector.load %arg1[%89, %c1_65, %c0_66] : memref<16x24x128xf32, #tpu.memory_space<vmem>>, vector<1x16x128xf32>
      %91 = vector.shape_cast %90 : vector<1x16x128xf32> to vector<16x128xf32>
      %92 = vector.broadcast %3 : vector<1x128xf32> to vector<16x128xf32>
      %93 = arith.mulf %83, %92 : vector<16x128xf32>
      %94 = arith.addf %79, %93 : vector<16x128xf32>
      %95 = vector.broadcast %4 : vector<1x128xf32> to vector<16x128xf32>
      %96 = arith.mulf %87, %95 : vector<16x128xf32>
      %97 = arith.addf %94, %96 : vector<16x128xf32>
      %98 = vector.broadcast %5 : vector<1x128xf32> to vector<16x128xf32>
      %99 = arith.mulf %91, %98 : vector<16x128xf32>
      %100 = arith.addf %97, %99 : vector<16x128xf32>
      %101 = arith.index_cast %78 : i32 to index
      %c0_67 = arith.constant 0 : index
      %c0_68 = arith.constant 0 : index
      %102 = vector.load %arg1[%101, %c0_67, %c0_68] : memref<16x24x128xf32, #tpu.memory_space<vmem>>, vector<1x16x128xf32>
      %103 = vector.shape_cast %102 : vector<1x16x128xf32> to vector<16x128xf32>
      %104 = arith.index_cast %78 : i32 to index
      %c0_69 = arith.constant 0 : index
      %c0_70 = arith.constant 0 : index
      %105 = vector.load %arg2[%104, %c0_69, %c0_70] : memref<16x24x128xf32, #tpu.memory_space<vmem>>, vector<1x16x128xf32>
      %106 = vector.shape_cast %105 : vector<1x16x128xf32> to vector<16x128xf32>
      %107 = arith.index_cast %78 : i32 to index
      %c1_71 = arith.constant 1 : index
      %c0_72 = arith.constant 0 : index
      %108 = vector.load %arg1[%107, %c1_71, %c0_72] : memref<16x24x128xf32, #tpu.memory_space<vmem>>, vector<1x16x128xf32>
      %109 = vector.shape_cast %108 : vector<1x16x128xf32> to vector<16x128xf32>
      %110 = vector.broadcast %6 : vector<1x128xf32> to vector<16x128xf32>
      %111 = arith.mulf %103, %110 : vector<16x128xf32>
      %112 = arith.addf %100, %111 : vector<16x128xf32>
      %113 = vector.broadcast %7 : vector<1x128xf32> to vector<16x128xf32>
      %114 = arith.mulf %106, %113 : vector<16x128xf32>
      %115 = arith.addf %112, %114 : vector<16x128xf32>
      %116 = vector.broadcast %8 : vector<1x128xf32> to vector<16x128xf32>
      %117 = arith.mulf %109, %116 : vector<16x128xf32>
      %118 = arith.addf %115, %117 : vector<16x128xf32>
      %c1_i32_73 = arith.constant 1 : i32
      %119 = arith.addi %78, %c1_i32_73 : i32
      %120 = arith.index_cast %119 : i32 to index
      %c0_74 = arith.constant 0 : index
      %c0_75 = arith.constant 0 : index
      %121 = vector.load %arg1[%120, %c0_74, %c0_75] : memref<16x24x128xf32, #tpu.memory_space<vmem>>, vector<1x16x128xf32>
      %122 = vector.shape_cast %121 : vector<1x16x128xf32> to vector<16x128xf32>
      %c1_i32_76 = arith.constant 1 : i32
      %123 = arith.addi %78, %c1_i32_76 : i32
      %124 = arith.index_cast %123 : i32 to index
      %c0_77 = arith.constant 0 : index
      %c0_78 = arith.constant 0 : index
      %125 = vector.load %arg2[%124, %c0_77, %c0_78] : memref<16x24x128xf32, #tpu.memory_space<vmem>>, vector<1x16x128xf32>
      %126 = vector.shape_cast %125 : vector<1x16x128xf32> to vector<16x128xf32>
      %c1_i32_79 = arith.constant 1 : i32
      %127 = arith.addi %78, %c1_i32_79 : i32
      %128 = arith.index_cast %127 : i32 to index
      %c1_80 = arith.constant 1 : index
      %c0_81 = arith.constant 0 : index
      %129 = vector.load %arg1[%128, %c1_80, %c0_81] : memref<16x24x128xf32, #tpu.memory_space<vmem>>, vector<1x16x128xf32>
      %130 = vector.shape_cast %129 : vector<1x16x128xf32> to vector<16x128xf32>
      %131 = vector.broadcast %9 : vector<1x128xf32> to vector<16x128xf32>
      %132 = arith.mulf %122, %131 : vector<16x128xf32>
      %133 = arith.addf %118, %132 : vector<16x128xf32>
      %134 = vector.broadcast %10 : vector<1x128xf32> to vector<16x128xf32>
      %135 = arith.mulf %126, %134 : vector<16x128xf32>
      %136 = arith.addf %133, %135 : vector<16x128xf32>
      %137 = vector.broadcast %11 : vector<1x128xf32> to vector<16x128xf32>
      %138 = arith.mulf %130, %137 : vector<16x128xf32>
      %139 = arith.addf %136, %138 : vector<16x128xf32>
      %140 = arith.addi %12, %arg11 : i32
      %141 = arith.index_cast %140 : i32 to index
      %c0_82 = arith.constant 0 : index
      %c0_83 = arith.constant 0 : index
      %142 = vector.load %arg6[%141, %c0_82, %c0_83] : memref<16x16x128xf32, #tpu.memory_space<vmem>>, vector<1x16x128xf32>
      %143 = vector.shape_cast %142 : vector<1x16x128xf32> to vector<16x128xf32>
      %144 = vector.shape_cast %139 : vector<16x128xf32> to vector<1x16x128xf32>
      tpu.vector_store %arg6[%141, %c0_82, %c0_83], %144 {strides = array<i32>} : memref<16x16x128xf32, #tpu.memory_space<vmem>>, vector<1x16x128xf32>,
      %145 = arith.addf %arg12, %139 : vector<16x128xf32>
      %146 = arith.mulf %139, %139 : vector<16x128xf32>
      %147 = arith.addf %arg13, %146 : vector<16x128xf32>
      scf.yield %145, %147 : vector<16x128xf32>, vector<16x128xf32>
    }
    %c7_i32_37 = arith.constant 7 : i32
    %c0_38 = arith.constant 0 : index
    %c0_39 = arith.constant 0 : index
    %63 = vector.load %arg7[%c0_38, %c0_39] : memref<16x128xf32, #tpu.memory_space<vmem>>, vector<16x128xf32>
    %64 = arith.addf %63, %62#0 : vector<16x128xf32>
    %c0_40 = arith.constant 0 : index
    %c0_41 = arith.constant 0 : index
    %65 = vector.load %arg7[%c0_40, %c0_41] : memref<16x128xf32, #tpu.memory_space<vmem>>, vector<16x128xf32>
    tpu.vector_store %arg7[%c0_40, %c0_41], %64 {strides = array<i32>} : memref<16x128xf32, #tpu.memory_space<vmem>>, vector<16x128xf32>,
    %c0_42 = arith.constant 0 : index
    %c0_43 = arith.constant 0 : index
    %66 = vector.load %arg8[%c0_42, %c0_43] : memref<16x128xf32, #tpu.memory_space<vmem>>, vector<16x128xf32>
    %67 = arith.addf %66, %62#1 : vector<16x128xf32>
    %c0_44 = arith.constant 0 : index
    %c0_45 = arith.constant 0 : index
    %68 = vector.load %arg8[%c0_44, %c0_45] : memref<16x128xf32, #tpu.memory_space<vmem>>, vector<16x128xf32>
    tpu.vector_store %arg8[%c0_44, %c0_45], %67 {strides = array<i32>} : memref<16x128xf32, #tpu.memory_space<vmem>>, vector<16x128xf32>,
    %c15 = arith.constant 15 : index
    %c0_46 = arith.constant 0 : index
    %c0_47 = arith.constant 0 : index
    %69 = vector.load %arg1[%c15, %c0_46, %c0_47] : memref<16x24x128xf32, #tpu.memory_space<vmem>>, vector<1x24x128xf32>
    %70 = vector.shape_cast %69 : vector<1x24x128xf32> to vector<24x128xf32>
    %c0_48 = arith.constant 0 : index
    %c0_49 = arith.constant 0 : index
    %71 = vector.load %arg9[%c0_48, %c0_49] : memref<24x128xf32, #tpu.memory_space<vmem>>, vector<24x128xf32>
    tpu.vector_store %arg9[%c0_48, %c0_49], %70 {strides = array<i32>} : memref<24x128xf32, #tpu.memory_space<vmem>>, vector<24x128xf32>,
    %c15_50 = arith.constant 15 : index
    %c0_51 = arith.constant 0 : index
    %c0_52 = arith.constant 0 : index
    %72 = vector.load %arg2[%c15_50, %c0_51, %c0_52] : memref<16x24x128xf32, #tpu.memory_space<vmem>>, vector<1x24x128xf32>
    %73 = vector.shape_cast %72 : vector<1x24x128xf32> to vector<24x128xf32>
    %c0_53 = arith.constant 0 : index
    %c0_54 = arith.constant 0 : index
    %74 = vector.load %arg10[%c0_53, %c0_54] : memref<24x128xf32, #tpu.memory_space<vmem>>, vector<24x128xf32>
    tpu.vector_store %arg10[%c0_53, %c0_54], %73 {strides = array<i32>} : memref<24x128xf32, #tpu.memory_space<vmem>>, vector<24x128xf32>,
    %c1_i32_55 = arith.constant 1 : i32
    %75 = arith.cmpi eq, %arg0, %c1_i32_55 : i32
    %76 = arith.extui %75 : i1 to i32
    %c0_i32_56 = arith.constant 0 : i32
    %77 = arith.cmpi ne, %76, %c0_i32_56 : i32
    scf.if %77 {
      %c0_57 = arith.constant 0 : index
      %c0_58 = arith.constant 0 : index
      %78 = vector.load %arg7[%c0_57, %c0_58] : memref<16x128xf32, #tpu.memory_space<vmem>>, vector<16x128xf32>
      %cst_59 = arith.constant dense<0.000000e+00> : vector<128xf32>
      %79 = vector.multi_reduction <add>, %78, %cst_59 [0] : vector<16x128xf32> to vector<128xf32>
      %80 = vector.shape_cast %79 : vector<128xf32> to vector<1x128xf32>
      %cst_60 = arith.constant 3.906250e-03 : f32
      %81 = vector.broadcast %cst_60 : f32 to vector<1x128xf32>
      %82 = arith.mulf %80, %81 : vector<1x128xf32>
      %c0_61 = arith.constant 0 : index
      %c0_62 = arith.constant 0 : index
      %83 = vector.load %arg8[%c0_61, %c0_62] : memref<16x128xf32, #tpu.memory_space<vmem>>, vector<16x128xf32>
      %cst_63 = arith.constant dense<0.000000e+00> : vector<128xf32>
      %84 = vector.multi_reduction <add>, %83, %cst_63 [0] : vector<16x128xf32> to vector<128xf32>
      %85 = vector.shape_cast %84 : vector<128xf32> to vector<1x128xf32>
      %cst_64 = arith.constant 3.906250e-03 : f32
      %86 = vector.broadcast %cst_64 : f32 to vector<1x128xf32>
      %87 = arith.mulf %85, %86 : vector<1x128xf32>
      %88 = arith.mulf %82, %82 : vector<1x128xf32>
      %89 = arith.subf %87, %88 : vector<1x128xf32>
      %cst_65 = arith.constant 0.000000e+00 : f32
      %90 = vector.broadcast %cst_65 : f32 to vector<1x128xf32>
      %91 = arith.maximumf %89, %90 : vector<1x128xf32>
      %c0_66 = arith.constant 0 : index
      %c0_67 = arith.constant 0 : index
      %92 = vector.load %arg4[%c0_66, %c0_67] : memref<1x128xf32, #tpu.memory_space<vmem>>, vector<1x128xf32>
      %cst_68 = arith.constant 9.99999974E-6 : f32
      %93 = vector.broadcast %cst_68 : f32 to vector<1x128xf32>
      %94 = arith.addf %91, %93 : vector<1x128xf32>
      %95 = math.rsqrt %94 : vector<1x128xf32>
      %96 = arith.mulf %92, %95 : vector<1x128xf32>
      %c0_69 = arith.constant 0 : index
      %c0_70 = arith.constant 0 : index
      %97 = vector.load %arg5[%c0_69, %c0_70] : memref<1x128xf32, #tpu.memory_space<vmem>>, vector<1x128xf32>
      %98 = arith.mulf %82, %96 : vector<1x128xf32>
      %99 = arith.subf %97, %98 : vector<1x128xf32>
      %c0_71 = arith.constant 0 : index
      %c0_72 = arith.constant 0 : index
      %c0_73 = arith.constant 0 : index
      %100 = vector.load %arg6[%c0_71, %c0_72, %c0_73] : memref<16x16x128xf32, #tpu.memory_space<vmem>>, vector<16x16x128xf32>
      %101 = vector.shape_cast %96 : vector<1x128xf32> to vector<1x1x128xf32>
      %102 = vector.broadcast %101 : vector<1x1x128xf32> to vector<16x16x128xf32>
      %103 = arith.mulf %100, %102 : vector<16x16x128xf32>
      %104 = vector.shape_cast %99 : vector<1x128xf32> to vector<1x1x128xf32>
      %105 = vector.broadcast %104 : vector<1x1x128xf32> to vector<16x16x128xf32>
      %106 = arith.addf %103, %105 : vector<16x16x128xf32>
      %c0_74 = arith.constant 0 : index
      %c0_75 = arith.constant 0 : index
      %c0_76 = arith.constant 0 : index
      %107 = vector.load %arg6[%c0_74, %c0_75, %c0_76] : memref<16x16x128xf32, #tpu.memory_space<vmem>>, vector<16x16x128xf32>
      tpu.vector_store %arg6[%c0_74, %c0_75, %c0_76], %106 {strides = array<i32>} : memref<16x16x128xf32, #tpu.memory_space<vmem>>, vector<16x16x128xf32>,
    } else {
    }
    return
  }
  func.func @transform_0(%arg0: i32) -> (i32, i32, i32) {
    %c0_i32 = arith.constant 0 : i32
    %c0_i32_0 = arith.constant 0 : i32
    %c0_i32_1 = arith.constant 0 : i32
    return %arg0, %c0_i32, %c0_i32_0 : i32, i32, i32
  }
  func.func @transform_1(%arg0: i32) -> (i32, i32, i32) {
    %c0_i32 = arith.constant 0 : i32
    %c0_i32_0 = arith.constant 0 : i32
    %c0_i32_1 = arith.constant 0 : i32
    return %arg0, %c0_i32, %c0_i32_0 : i32, i32, i32
  }
  func.func @transform_2(%arg0: i32) -> (i32, i32) {
    %c0_i32 = arith.constant 0 : i32
    %c0_i32_0 = arith.constant 0 : i32
    %c0_i32_1 = arith.constant 0 : i32
    return %c0_i32, %c0_i32_0 : i32, i32
  }
  func.func @transform_3(%arg0: i32) -> (i32, i32) {
    %c0_i32 = arith.constant 0 : i32
    %c0_i32_0 = arith.constant 0 : i32
    %c0_i32_1 = arith.constant 0 : i32
    return %c0_i32, %c0_i32_0 : i32, i32
  }
  func.func @transform_4(%arg0: i32) -> (i32, i32) {
    %c0_i32 = arith.constant 0 : i32
    %c0_i32_0 = arith.constant 0 : i32
    %c0_i32_1 = arith.constant 0 : i32
    return %c0_i32, %c0_i32_0 : i32, i32
  }
  func.func @transform_5(%arg0: i32) -> (i32, i32, i32) {
    %c0_i32 = arith.constant 0 : i32
    %c0_i32_0 = arith.constant 0 : i32
    %c0_i32_1 = arith.constant 0 : i32
    %c0_i32_2 = arith.constant 0 : i32
    return %c0_i32, %c0_i32_0, %c0_i32_1 : i32, i32, i32
  }
}

</mosaic_0001>

<bundles_post_ra>
// kernel: tpu_custom_call.1
= control target key start
LH: loop header
LB: loop body
LE: loop exit
PB: predicated region body
PF: predicated region fallthrough
CT: control target
= control target key end

     0   :  { %10 = vsyncpa [#allocation7], 0  ;;  %s1644_s0 = inlined_call_operand.hbm [shape: f32[32,24,128], index: 0, kind: input, shape index: {}]   ;;  %s1645_s1 = inlined_call_operand.hbm [shape: f32[32,24,128], index: 1, kind: input, shape index: {}]   ;;  %s1646_s2 = inlined_call_operand.hbm [shape: f32[9,128], index: 2, kind: input, shape index: {}]   ;;  %s1647_s3 = inlined_call_operand.vmem [shape: f32[1,128], index: 3, kind: input, shape index: {}]   ;;  %s1648_s4 = inlined_call_operand.vmem [shape: f32[1,128], index: 4, kind: input, shape index: {}]   ;;  %s1649_s5 = inlined_call_operand.hbm [shape: f32[16,16,128], index: 5, kind: output, shape index: {}]  }
   0x1   :  { %12 = vsyncpa [#allocation7 + $0x1], 0 }
   0x2   :  { %13 = vsyncpa [#allocation10], 0 }
   0x3   :  { %15 = vsyncpa [#allocation10 + $0x1], 0 }
   0x4   :  { %16 = vsyncpa [#allocation8], 0  ;;  %s1231_s18 = smov 0   ;;  %s1233_s19 = smov 0  }
   0x5   :  { %s1235_s20 = smov 0   ;;  %s1237_s21 = smov 0  }
   0x6 LB: > { %s1250_s22 = sadd.s32 4294967295, %s1170_s21   ;;  %p42_p0 = scmp.ne.s32.totalorder %s1162_s19, %s1158_s18  ;;  %s1170_s21 = sphi %s1237_s21, %s1667_s21   ;;  %s1166_s20 = sphi %s1235_s20, %s1666_s20   ;;  %s1162_s19 = sphi %s1233_s19, %s1665_s19   ;;  %s1158_s18 = sphi %s1231_s18, %s1664_s18  }
   0x7   : > { %p1650_p1 = scmp.eq.s32.totalorder %s1250_s22, 0  ;;  %p829_p2 = scmp.ge.s32.totalorder %s1170_s21, 1 }
   0x8   : > { %p163_p3 = scmp.lt.s32.totalorder %s1170_s21, 3  ;;  %s1192_s25 = smov [#allocation11]  }
   0x9   : > { %p1259_p5 = por %p1650_p1, %p42_p0  ;;  %s175_s26 = sshll.u32 %s1192_s25, 4  ;;  %s176_s26 = int_to_ptr.vmem [resolvable:$true] %s175_s26 }
   0xa   : > { %p1263_p6 = pnand %p829_p2, %p163_p3  ;;  %s1276_s28 = sadd.s32 1, %s1170_s21  }
   0xb   : > { %s1652_s23 = scalar_select %p1259_p5, 1, 0 }
   0xc   : > { %p901_p7 = pneg %p1263_p6  ;;  %s29_s29 = sadd.s32 1, %s1166_s20 }
   0xd   : > { %s26_s30 = ssub.s32 %s1170_s21, %s1276_s28  ;;  %s1009_s6 = scalar_lea.vmem %s176_s26, 256 }
   0xe   : > { %p1271_p8 = pnand %p901_p7, %p1650_p1  ;;  %p1010_p10 = scmp.ne.s32.totalorder %s176_s26, %s1009_s6 }
   0xf   : > { %p1017_p13 = scmp.lt.s32.totalorder %s176_s26, %s176_s26  ;;  %p1018_p0 = scmp.lt.s32.totalorder %s1009_s6, %s1009_s6 }
  0x10   : > { %p1000_p9 = pneg %p1271_p8 }
  0x11   : > { %p1019_p2 = por %p1018_p0, %p1017_p13 }
  0x12   : > { %p1012_p11 = pnand %p1010_p10, %p1000_p9 }
  0x14   : > { %p1013_p12 = pneg %p1012_p11 }
  0x16   : > { %p1020_p3 = pnand %p1019_p2, %p1013_p12 }
  0x18   : > { %1023 = shalt.err (!%p1020_p3)
}
  0x19   : > { %s1193_s7 = smov 128   ;;  %s1194_s8 = smov 8  }
  0x1a   : > { %904 = dma.hbm_to_vmem [thread:$0]  (!%p1271_p8), %s1646_s2, 256, %s176_s26, [#allocation10], %s1193_s7, %s1193_s7, %s1194_s8  }
  0x1b   : > { %p27_p7 = scmp.eq.s32.totalorder %s26_s30, 0  ;;  %p36_p9 = scmp.ne.s32.totalorder %s1166_s20, %s1162_s19 }
  0x1c   : > { %p37_p10 = scmp.eq.s32.totalorder %s1170_s21, 0  ;;  %p913_p11 = scmp.lt.s32.totalorder %s1170_s21, 2 }
  0x1d   : > { %s1296_s11 = scalar_select %p27_p7, %s1166_s20, %s29_s29  }
  0x1e   : > { %p38_p12 = por %p37_p10, %p36_p9  ;;  %s195_s12 = sand.u32 1, %s1166_s20  }
  0x1f   : > { %s1299_s13 = smul.u32 384, %s195_s12  ;;  %s217_s16 = sand.u32 1, %s1170_s21  }
  0x20   : > { %s885_s14 = smul.u32 6144, %s1170_s21  ;;  %p1302_p13 = pnand %p913_p11, %p38_p12 }
  0x21   : > { %s199_s26 = scalar_lea.vmem [#allocation6], %s1299_s13  ;;  %s1317_s29 = scalar_lea.sflag [#allocation7], %s195_s12 }
  0x22   : > { %s1312_s25 = scalar_lea.hbm %s1644_s0, %s885_s14  ;;  %s207_s27 = sshll.u32 %s199_s26, 4  ;;  %s1315_s27 = int_to_ptr.vmem [resolvable:$true] %s207_s27 }
  0x23   : > { %s1024_s30 = scalar_lea.hbm %s1312_s25, 6144  ;;  %p1026_p0 = pneg %p1302_p13 }
  0x24   : > { %p1025_p8 = scmp.ne.s32.totalorder %s1312_s25, %s1024_s30  ;;  %s1029_s10 = scalar_lea.hbm %s1644_s0, 12288 }
  0x25   : > { %p1030_p7 = scmp.lt.s32.totalorder %s1312_s25, %s1644_s0  ;;  %p1031_p9 = scmp.lt.s32.totalorder %s1029_s10, %s1024_s30 }
  0x26   : > { %p1027_p2 = pnand %p1026_p0, %p1025_p8 }
  0x27   : > { %p1032_p10 = por %p1031_p9, %p1030_p7 }
  0x28   : > { %p1028_p3 = pneg %p1027_p2 }
  0x2a   : > { %p1033_p11 = pnand %p1032_p10, %p1028_p3 }
  0x2c   : > { %1036 = shalt.err (!%p1033_p11)
}
  0x2d   : > { %s1037_s12 = scalar_lea.vmem %s1315_s27, 6144  ;;  %s1195_s26 = smov [#allocation6]  }
  0x2e   : > { %p1038_p12 = scmp.ne.s32.totalorder %s1315_s27, %s1037_s12  ;;  %s1042_s6 = sshll.u32 %s1195_s26, 4  ;;  %s1043_s6 = int_to_ptr.vmem [resolvable:$false] %s1042_s6 }
  0x2f   : > { %s1044_s9 = scalar_lea.vmem %s1043_s6, 12288  ;;  %p1045_p4 = scmp.lt.s32.totalorder %s1315_s27, %s1043_s6 }
  0x30   : > { %p1040_p8 = pnand %p1038_p12, %p1026_p0  ;;  %p1046_p1 = scmp.lt.s32.totalorder %s1044_s9, %s1037_s12 }
  0x32   : > { %p1041_p2 = pneg %p1040_p8  ;;  %p1047_p5 = por %p1046_p1, %p1045_p4 }
  0x34   : > { %p1048_p7 = pnand %p1047_p5, %p1041_p2 }
  0x36   : > { %1051 = shalt.err (!%p1048_p7)
}
  0x37   : > { %908 = dma.hbm_to_vmem [thread:$0]  (!%p1302_p13), %s1312_s25, 6144, %s1315_s27, %s1317_s29, %s1193_s7, %s1193_s7, %s1194_s8  }
  0x38   : > { %s1352_s17 = scalar_lea.hbm %s1645_s1, %s885_s14  ;;  %s221_s18 = scalar_lea.vmem [#allocation9], %s1299_s13 }
  0x39   : > { %s229_s12 = sshll.u32 %s221_s18, 4  ;;  %s218_s26 = scalar_lea.sflag [#allocation10], %s217_s16  ;;  %s1355_s12 = int_to_ptr.vmem [resolvable:$true] %s229_s12 }
  0x3a   : > { %s1052_s6 = scalar_lea.hbm %s1352_s17, 6144  ;;  %s1057_s14 = scalar_lea.hbm %s1645_s1, 12288 }
  0x3b   : > { %p1053_p1 = scmp.ne.s32.totalorder %s1352_s17, %s1052_s6  ;;  %p1058_p3 = scmp.lt.s32.totalorder %s1352_s17, %s1645_s1 }
  0x3c   : > { %p1059_p9 = scmp.lt.s32.totalorder %s1057_s14, %s1052_s6 }
  0x3d   : > { %p1055_p4 = pnand %p1053_p1, %p1026_p0 }
  0x3e   : > { %p1060_p10 = por %p1059_p9, %p1058_p3 }
  0x3f   : > { %p1056_p5 = pneg %p1055_p4 }
  0x41   : > { %p1061_p11 = pnand %p1060_p10, %p1056_p5 }
  0x43   : > { %1064 = shalt.err (!%p1061_p11)
}
  0x44   : > { %s1065_s21 = scalar_lea.vmem %s1355_s12, 6144  ;;  %s1196_s13 = smov [#allocation9]  }
  0x45   : > { %p1066_p12 = scmp.ne.s32.totalorder %s1355_s12, %s1065_s21  ;;  %s1070_s16 = sshll.u32 %s1196_s13, 4  ;;  %s1071_s16 = int_to_ptr.vmem [resolvable:$false] %s1070_s16 }
  0x46   : > { %s1072_s30 = scalar_lea.vmem %s1071_s16, 12288  ;;  %p1073_p7 = scmp.lt.s32.totalorder %s1355_s12, %s1071_s16 }
  0x47   : > { %p1068_p8 = pnand %p1066_p12, %p1026_p0  ;;  %p1074_p1 = scmp.lt.s32.totalorder %s1072_s30, %s1065_s21 }
  0x49   : > { %p1069_p2 = pneg %p1068_p8  ;;  %p1075_p4 = por %p1074_p1, %p1073_p7 }
  0x4b   : > { %p1076_p3 = pnand %p1075_p4, %p1069_p2 }
  0x4d   : > { %1079 = shalt.err (!%p1076_p3)
}
  0x4e   : > { %911 = dma.hbm_to_vmem [thread:$0]  (!%p1302_p13), %s1352_s17, 6144, %s1355_s12, %s218_s26, %s1193_s7, %s1193_s7, %s1194_s8  }
  0x4f   : > { %241 = sbr.rel (%p1263_p6) target bundleno = 250 (0xfa), region = 40  ;;  %s243_s10 = sand.u32 (!%p1263_p6), 1, %s1162_s19  }
  0x50   : > { %s888_s18 = smul.u32 (!%p1263_p6), 384, %s243_s10  ;;  %s244_s6 = scalar_lea.sflag (!%p1263_p6), [#allocation7], %s243_s10 }
  0x51   : > { %p1656_p0 = scmp.ne.s32.totalorder (!%p1263_p6), %s1652_s23, 0 }
  0x52   : > { %s1387_s25 = scalar_lea.vmem (!%p1263_p6), [#allocation6], %s888_s18 }
  0x54   : > { %1141 = dma.done.wait (%p1656_p0), %s244_s6, 6144  }
  0x55   : > { %1143 = vsyncadd (%p1656_p0), %s244_s6, 4294961152  ;;  %s252_s15 = sand.u32 1, %s1250_s22   ;;  %s1394_s7 = scalar_lea.vmem [#allocation9], %s888_s18 }
  0x56   : > { %s253_s27 = scalar_lea.sflag [#allocation10], %s252_s15 }
  0x57   : > { %1145 = dma.done.wait (%p1656_p0), %s253_s27, 6144  }
  0x58   : > { %1147 = vsyncadd (%p1656_p0), %s253_s27, 4294961152  ;;  %p1657_p6 = scmp.eq.s32.totalorder %s1250_s22, 0 }
  0x5a   : > { %1149 = dma.done.wait (%p1657_p6), [#allocation10], 256   ;;  %p1658_p13 = pmov %p1657_p6 }
  0x5b   : > { %p1659_p5 = scmp.ne.s32.totalorder %s1250_s22, 0 }
  0x5c   : > { %1151 = vsyncadd (%p1658_p13), [#allocation10], 4294967040 }
  0x5d   : > { %292 = sbr.rel (%p1659_p5) target bundleno = 104 (0x68), region = 56 }
  0x62   : > { %v1197_v0 = vmov 0.0  }
  0x63   : > { %293 = vst [vmem:[#allocation2] sm:$0xff] %v1197_v0  ;;  %294 = vst [vmem:[#allocation2 + $0x8] sm:$0xff] %v1197_v0 }
  0x64   : > { %295 = vst [vmem:[#allocation3 + $0x8] sm:$0xff] %v1197_v0  ;;  %296 = vst [vmem:[#allocation3] sm:$0xff] %v1197_v0 }
  0x65   : > { %297 = vst [vmem:[#allocation4] sm:$0xff] %v1197_v0  ;;  %298 = vst [vmem:[#allocation4 + $0x8] sm:$0xff] %v1197_v0 }
  0x66   : > { %299 = vst [vmem:[#allocation4 + $0x10] sm:$0xff] %v1197_v0  ;;  %300 = vst [vmem:[#allocation5 + $0x8] sm:$0xff] %v1197_v0 }
  0x67   : > { %301 = vst [vmem:[#allocation5] sm:$0xff] %v1197_v0 }
  0x68 PF: > { %v1406_v1 = vld [vmem:[#allocation11] ss:$0 sm:$0xff]  ;;  %v1408_v2 = vld [vmem:[#allocation11 + $0x1] ss:$0 sm:$0xff]  ;;  %v1410_v3 = vld [vmem:[#allocation11 + $0x2] ss:$0 sm:$0xff] }
  0x69   : > { %v1412_v4 = vld [vmem:[#allocation11 + $0x3] ss:$0 sm:$0xff]  ;;  %s841_s23 = sshll.u32 %s1250_s22, 3  ;;  %v1419_v12 = vld [vmem:[#allocation11 + $0x4] ss:$0 sm:$0xff]  ;;  %v344_v24 = vld [vmem:[%s1387_s25 + $0x8] sm:$0xff] }
  0x6a   : > { %v343_v11 = vld [vmem:[%s1387_s25] sm:$0xff]  ;;  %v346_v27 = vld [vmem:[%s1394_s7 + $0x8] sm:$0xff]  ;;  %v848_v29 = vld [vmem:[%s1387_s25 + $0x18] sm:$0xff]  ;;  %v354_v31 = vmul.f32 %v1412_v4, %v344_v24  ;;  %s883_s24 = sshll.u32 %s1250_s22, 7  ;;  %s1464_s17 = smov 1  }
  0x6b   : > { %v345_v13 = vld [vmem:[%s1394_s7] sm:$0xff]  ;;  %v353_v15 = vmul.f32 %v1412_v4, %v343_v11  ;;  %v348_v34 = vld [vmem:[%s1387_s25 + $0x9] sm:$0xff]  ;;  %v850_v36 = vld [vmem:[%s1394_s7 + $0x18] sm:$0xff]  ;;  %v362_v38 = vmul.f32 %v1419_v12, %v346_v27  ;;  %s406_s8 = scalar_lea.vmem [#allocation12], %s883_s24 }
  0x6c   : > { %v313_v5 = vld [vmem:[#allocation4] sm:$0xff]  ;;  %v314_v16 = vld [vmem:[#allocation4 + $0x8] sm:$0xff]  ;;  %v1423_v19 = vld [vmem:[#allocation11 + $0x5] ss:$0 sm:$0xff]  ;;  %v361_v26 = vmul.f32 %v1419_v12, %v345_v13 }
  0x6d   : > { %v315_v6 = vld [vmem:[#allocation5 + $0x8] sm:$0xff]  ;;  %v323_v8 = vmul.f32 %v1406_v1, %v313_v5  ;;  %v318_v18 = vld [vmem:[#allocation4 + $0x9] sm:$0xff]  ;;  %v347_v20 = vld [vmem:[%s1387_s25 + $0x1] sm:$0xff]  ;;  %v324_v21 = vmul.f32 %v1406_v1, %v314_v16  ;;  %v370_v45 = vmul.f32 %v1423_v19, %v348_v34 }
  0x6e   : > { %v317_v7 = vld [vmem:[#allocation4 + $0x1] sm:$0xff]  ;;  %v331_v9 = vmul.f32 %v1408_v2, %v315_v6  ;;  %v316_v17 = vld [vmem:[#allocation5] sm:$0xff]  ;;  %v340_v23 = vmul.f32 %v1410_v3, %v318_v18  ;;  %v1432_v28 = vld [vmem:[#allocation11 + $0x6] ss:$0 sm:$0xff]  ;;  %v369_v33 = vmul.f32 %v1423_v19, %v347_v20 }
  0x6f   : > { %v339_v10 = vmul.f32 %v1410_v3, %v317_v7  ;;  %v332_v22 = vmul.f32 %v1408_v2, %v316_v17  ;;  %v1438_v35 = vld [vmem:[#allocation11 + $0x7] ss:$0 sm:$0xff]  ;;  %v385_v40 = vmul.f32 %v1432_v28, %v848_v29  ;;  %v1444_v42 = vld [vmem:[#allocation11 + $0x8] ss:$0 sm:$0xff]  ;;  %v852_v43 = vld [vmem:[%s1387_s25 + $0x19] sm:$0xff] }
  0x70   : > { %v333_v14 = vadd.f32 %v331_v9, %v323_v8  ;;  %v849_v41 = vld [vmem:[%s1387_s25 + $0x20] sm:$0xff]  ;;  %v393_v47 = vmul.f32 %v1438_v35, %v850_v36  ;;  %v401_v52 = vmul.f32 %v1444_v42, %v852_v43 }
  0x71   : > { %v334_v30 = vadd.f32 %v332_v22, %v324_v21  ;;  %v851_v48 = vld [vmem:[%s1394_s7 + $0x20] sm:$0xff]  ;;  %v386_v50 = vmul.f32 %v1432_v28, %v849_v41 }
  0x72   : > { %v341_v25 = vadd.f32 %v339_v10, %v333_v14  ;;  %v853_v53 = vld [vmem:[%s1387_s25 + $0x21] sm:$0xff]  ;;  %v394_v55 = vmul.f32 %v1438_v35, %v851_v48 }
  0x73   : > { %v342_v37 = vadd.f32 %v340_v23, %v334_v30  ;;  %v402_v58 = vmul.f32 %v1444_v42, %v853_v53 }
  0x74   : > { %v355_v32 = vadd.f32 %v353_v15, %v341_v25 }
  0x75   : > { %v356_v44 = vadd.f32 %v354_v31, %v342_v37 }
  0x76   : > { %v363_v39 = vadd.f32 %v361_v26, %v355_v32 }
  0x77   : > { %v364_v49 = vadd.f32 %v362_v38, %v356_v44 }
  0x78   : > { %v371_v46 = vadd.f32 %v369_v33, %v363_v39 }
  0x79   : > { %v372_v54 = vadd.f32 %v370_v45, %v364_v49 }
  0x7a   : > { %v387_v51 = vadd.f32 %v385_v40, %v371_v46 }
  0x7b   : > { %v388_v57 = vadd.f32 %v386_v50, %v372_v54 }
  0x7c   : > { %v395_v56 = vadd.f32 %v393_v47, %v387_v51 }
  0x7d   : > { %v396_v60 = vadd.f32 %v394_v55, %v388_v57 }
  0x7e   : > { %v403_v59 = vadd.f32 %v401_v52, %v395_v56  }
  0x7f   : > { %v404_v62 = vadd.f32 %v402_v58, %v396_v60  }
  0x80   : > { %407 = vst [vmem:[%s406_s8] sm:$0xff] %v403_v59  ;;  %v409_v61 = vmul.f32 %v403_v59, %v403_v59  }
  0x81   : > { %408 = vst [vmem:[%s406_s8 + $0x8] sm:$0xff] %v404_v62  ;;  %v410_v63 = vmul.f32 %v404_v62, %v404_v62  }
  0x82 LB: >> { %s858_s12 = sshll.u32 %s1190_s17, 1  ;;  %s860_s26 = smul.u32 48, %s1190_s17  ;;  %s1190_s17 = sphi %s1464_s17, %s416_s17   ;;  %v1186_v59 = vphi %v403_v59, %v1663_v59   ;;  %v1182_v62 = vphi %v404_v62, %v1662_v62   ;;  %v1178_v61 = vphi %v409_v61, %v1661_v61   ;;  %v1174_v63 = vphi %v410_v63, %v1660_v63  }
  0x83   : >> { %s859_s14 = sadd.s32 4294967295, %s858_s12  ;;  %s487_s30 = sadd.s32 %s1190_s17, %s841_s23 }
  0x84   : >> { %s423_s29 = smul.u32 24, %s859_s14  ;;  %s1484_s9 = scalar_lea.vmem %s1387_s25, %s860_s26 [#allocation6] }
  0x85   : >> { %s1487_s21 = scalar_lea.vmem %s1394_s7, %s860_s26 [#allocation9]  ;;  %v446_v0 = vld [vmem:[%s1484_s9] sm:$0xff]  ;;  %v447_v20 = vld [vmem:[%s1484_s9 + $0x8] sm:$0xff]  ;;  %v863_v33 = vld [vmem:[%s1484_s9 + $0x18] sm:$0xff]  ;;  %s871_s10 = sshll.u32 %s487_s30, 4 }
  0x86   : >> { %s424_s13 = scalar_lea.vmem %s1387_s25, %s423_s29 [#allocation6]  ;;  %s427_s16 = scalar_lea.vmem %s1394_s7, %s423_s29 [#allocation9]  ;;  %v449_v18 = vld [vmem:[%s1487_s21] sm:$0xff]  ;;  %v450_v22 = vld [vmem:[%s1487_s21 + $0x8] sm:$0xff]  ;;  %v453_v23 = vmul.f32 %v1412_v4, %v446_v0  ;;  %v454_v26 = vmul.f32 %v1412_v4, %v447_v20  ;;  %v867_v38 = vld [vmem:[%s1487_s21 + $0x18] sm:$0xff]  ;;  %v475_v43 = vmul.f32 %v863_v33, %v1432_v28 }
  0x87   : >> { %v425_v5 = vld [vmem:[%s424_s13] sm:$0xff]  ;;  %v426_v6 = vld [vmem:[%s424_s13 + $0x8] sm:$0xff]  ;;  %v457_v29 = vmul.f32 %v1419_v12, %v449_v18  ;;  %v458_v32 = vmul.f32 %v1419_v12, %v450_v22  ;;  %v479_v49 = vmul.f32 %v867_v38, %v1438_v35  ;;  %s489_s18 = scalar_lea.vmem [#allocation12], %s871_s10  ;;  %s416_s17 = sadd.s32 1, %s1190_s17  }
  0x88   : >> { %v428_v7 = vld [vmem:[%s427_s16] sm:$0xff]  ;;  %v429_v8 = vld [vmem:[%s427_s16 + $0x8] sm:$0xff]  ;;  %v432_v11 = vmul.f32 %v1406_v1, %v425_v5  ;;  %v433_v13 = vmul.f32 %v1406_v1, %v426_v6  ;;  %p413_p9 = scmp.ge.s32.totalorder %s416_s17, 8  }
  0x89   : >> { %v430_v9 = vld [vmem:[%s424_s13 + $0x1] sm:$0xff]  ;;  %v431_v10 = vld [vmem:[%s424_s13 + $0x9] sm:$0xff]  ;;  %v436_v14 = vmul.f32 %v1408_v2, %v428_v7  ;;  %v437_v15 = vmul.f32 %v1408_v2, %v429_v8  ;;  %v869_v45 = vld [vmem:[%s1484_s9 + $0x19] sm:$0xff]  ;;  %p878_p10 = scmp.ne.s32.totalorder (%p413_p9), %s1250_s22, 1 }
  0x8a   : >> { %v440_v16 = vmul.f32 %v1410_v3, %v430_v9  ;;  %v441_v17 = vmul.f32 %v1410_v3, %v431_v10  ;;  %v451_v25 = vld [vmem:[%s1484_s9 + $0x1] sm:$0xff]  ;;  %v452_v30 = vld [vmem:[%s1484_s9 + $0x9] sm:$0xff]  ;;  %v483_v54 = vmul.f32 %v869_v45, %v1444_v42  ;;  %v872_v18 = vld [vmem:[%s1387_s25 + $0x168] sm:$0xff] (%p413_p9) }
  0x8b   : >> { %v438_v21 = vadd.f32 %v436_v14, %v432_v11  ;;  %v439_v24 = vadd.f32 %v437_v15, %v433_v13  ;;  %v461_v36 = vmul.f32 %v1423_v19, %v451_v25  ;;  %v864_v37 = vld [vmem:[%s1484_s9 + $0x20] sm:$0xff]  ;;  %v462_v40 = vmul.f32 %v1423_v19, %v452_v30  ;;  %v499_v11 = vld [vmem:[#allocation2 + $0x8] sm:$0xff] (%p413_p9)  ;;  %v504_v13 = vld [vmem:[#allocation3 + $0x8] sm:$0xff] (%p413_p9)  ;;  %514 = vst [vmem:[#allocation4] sm:$0xff] (%p413_p9), %v872_v18 }
  0x8c   : >> { %v868_v44 = vld [vmem:[%s1487_s21 + $0x20] sm:$0xff]  ;;  %v476_v47 = vmul.f32 %v864_v37, %v1432_v28  ;;  %v874_v22 = vld [vmem:[%s1387_s25 + $0x178] sm:$0xff] (%p413_p9) }
  0x8d   : >> { %v442_v27 = vadd.f32 %v440_v16, %v438_v21  ;;  %v443_v31 = vadd.f32 %v441_v17, %v439_v24  ;;  %v870_v50 = vld [vmem:[%s1484_s9 + $0x21] sm:$0xff]  ;;  %v480_v52 = vmul.f32 %v868_v44, %v1438_v35  ;;  %v505_v17 = vld [vmem:[#allocation3] sm:$0xff] (%p413_p9)  ;;  %516 = vst [vmem:[#allocation4 + $0x10] sm:$0xff] (%p413_p9), %v874_v22 }
  0x8e   : >> { %v484_v56 = vmul.f32 %v870_v50, %v1444_v42  ;;  %v873_v20 = vld [vmem:[%s1387_s25 + $0x170] sm:$0xff] (%p413_p9) }
  0x8f   : >> { %v455_v34 = vadd.f32 %v453_v23, %v442_v27  ;;  %v456_v39 = vadd.f32 %v454_v26, %v443_v31  ;;  %515 = vst [vmem:[#allocation4 + $0x8] sm:$0xff] (%p413_p9), %v873_v20  ;;  %v875_v23 = vld [vmem:[%s1394_s7 + $0x168] sm:$0xff] (%p413_p9)  ;;  %v876_v24 = vld [vmem:[%s1394_s7 + $0x170] sm:$0xff] (%p413_p9) }
  0x90   : > { %521 = vst [vmem:[#allocation5 + $0x8] sm:$0xff] (%p413_p9), %v875_v23  ;;  %522 = vst [vmem:[#allocation5] sm:$0xff] (%p413_p9), %v876_v24 }
  0x91   : >> { %v459_v41 = vadd.f32 %v457_v29, %v455_v34  ;;  %v460_v46 = vadd.f32 %v458_v32, %v456_v39 }
  0x93   : >> { %v463_v48 = vadd.f32 %v461_v36, %v459_v41  ;;  %v464_v51 = vadd.f32 %v462_v40, %v460_v46 }
  0x95   : >> { %v477_v53 = vadd.f32 %v475_v43, %v463_v48  ;;  %v478_v55 = vadd.f32 %v476_v47, %v464_v51 }
  0x97   : >> { %v481_v57 = vadd.f32 %v479_v49, %v477_v53  ;;  %v482_v58 = vadd.f32 %v480_v52, %v478_v55 }
  0x99   : >> { %v485_v60 = vadd.f32 %v483_v54, %v481_v57  ;;  %v486_v0 = vadd.f32 %v484_v56, %v482_v58 }
  0x9b   : >> { %490 = vst [vmem:[%s489_s18] sm:$0xff] %v485_v60  ;;  %v492_v5 = vadd.f32 %v1186_v59, %v485_v60   ;;  %v494_v6 = vmul.f32 %v485_v60, %v485_v60  ;;  %491 = vst [vmem:[%s489_s18 + $0x8] sm:$0xff] %v486_v0  ;;  %v493_v7 = vadd.f32 %v1182_v62, %v486_v0  }
  0x9c   : >> { %v495_v8 = vmul.f32 %v486_v0, %v486_v0  ;;  %415 = sbr.rel (!%p413_p9) target bundleno = 130 (0x82), region = 121 }
  0x9d   : >> { %v496_v9 = vadd.f32 %v1178_v61, %v494_v6   ;;  %v1662_v62 = vmov %v493_v7  ;;  %v1663_v59 = vmov %v492_v5  ;;  %v501_v15 = vadd.f32 (%p413_p9), %v499_v11, %v493_v7 }
  0x9e   : >> { %v497_v10 = vadd.f32 %v1174_v63, %v495_v8   ;;  %v498_v59 = vld [vmem:[#allocation2] sm:$0xff] (%p413_p9) }
  0x9f   : >> { %v1661_v61 = vmov %v496_v9  ;;  %v500_v14 = vadd.f32 (%p413_p9), %v498_v59, %v492_v5  ;;  %v506_v16 = vadd.f32 (%p413_p9), %v504_v13, %v496_v9  ;;  %503 = vst [vmem:[#allocation2 + $0x8] sm:$0xff] (%p413_p9), %v501_v15 }
  0xa0   : >> { %v1660_v63 = vmov %v497_v10  ;;  %v507_v21 = vadd.f32 (%p413_p9), %v505_v17, %v497_v10 }
  0xa1   : > { %502 = vst [vmem:[#allocation2] sm:$0xff] %v500_v14  ;;  %508 = vst [vmem:[#allocation3 + $0x8] sm:$0xff] %v506_v16  ;;  %527 = sbr.rel (%p878_p10) target bundleno = 234 (0xea), region = 67 }
  0xa2   : > { %509 = vst [vmem:[#allocation3] sm:$0xff] %v507_v21 }
  0xa6   : > { %v529_v2 = vld [vmem:[#allocation2 + $0x8] sm:$0xff]  ;;  %v591_v39 = vlaneseq  ;;  %v551_v41 = vld [vmem:[%s1647_s3] sm:$0x1]  ;;  %v560_v49 = vld [vmem:[#allocation12 + $0x10] sm:$0xff] }
  0xa7   : > { %v555_v46 = vld [vmem:[%s1648_s4] sm:$0x1]  ;;  %v559_v48 = vld [vmem:[#allocation12 + $0x8] sm:$0xff]  ;;  %v561_v50 = vld [vmem:[#allocation12 + $0x18] sm:$0xff] }
  0xa8   : > { %v528_v1 = vld [vmem:[#allocation2] sm:$0xff]  ;;  %v538_v3 = vld [vmem:[#allocation3 + $0x8] sm:$0xff]  ;;  %v592_v40 = vshrl.u32 %v591_v39, 7  ;;  %v563_v54 = vld [vmem:[#allocation12 + $0x28] sm:$0xff] }
  0xa9   : > { %v530_v4 = vadd.f32 %v529_v2, %v528_v1  ;;  %v539_v12 = vld [vmem:[#allocation3] sm:$0xff]  ;;  %v558_v47 = vld [vmem:[#allocation12] sm:$0xff]  ;;  %v565_v56 = vld [vmem:[#allocation12 + $0x38] sm:$0xff] }
  0xaa   : > { %v540_v19 = vadd.f32 %v539_v12, %v538_v3  ;;  %v593_v43 = vsub.s32 0, %v592_v40  ;;  %v562_v51 = vld [vmem:[#allocation12 + $0x20] sm:$0xff]  ;;  %v564_v55 = vld [vmem:[#allocation12 + $0x30] sm:$0xff]  ;;  %v567_v58 = vld [vmem:[#allocation12 + $0x48] sm:$0xff] }
  0xab   : > { %v531_v28 = vrot.slane %v530_v4, 4  ;;  %v566_v57 = vld [vmem:[#allocation12 + $0x40] sm:$0xff]  ;;  %v568_v60 = vld [vmem:[#allocation12 + $0x50] sm:$0xff]  ;;  %v569_v8 = vld [vmem:[#allocation12 + $0x58] sm:$0xff] }
  0xac   : > { %v541_v35 = vrot.slane %v540_v19, 4  ;;  %v570_v9 = vld [vmem:[#allocation12 + $0x60] sm:$0xff]  ;;  %v571_v10 = vld [vmem:[#allocation12 + $0x68] sm:$0xff]  ;;  %v573_v12 = vld [vmem:[#allocation12 + $0x78] sm:$0xff] }
  0xad   : > { %v532_v42 = vadd.f32 %v531_v28, %v530_v4  ;;  %v572_v4 = vld [vmem:[#allocation12 + $0x70] sm:$0xff] }
  0xae   : > { %v542_v61 = vadd.f32 %v541_v35, %v540_v19  ;;  %v574_v19 = vld [vmem:[#allocation12 + $0x80] sm:$0xff] }
  0xaf   : > { %v533_v62 = vrot.slane %v532_v42, 2 }
  0xb0   : > { %v543_v63 = vrot.slane %v542_v61, 2 }
  0xb1   : > { %v534_v25 = vadd.f32 %v533_v62, %v532_v42  ;;  %v575_v62 = vld [vmem:[#allocation12 + $0x88] sm:$0xff] }
  0xb2   : > { %v544_v26 = vadd.f32 %v543_v63, %v542_v61  ;;  %v576_v63 = vld [vmem:[#allocation12 + $0x90] sm:$0xff] }
  0xb3   : > { %v535_v27 = vrot.slane %v534_v25, 1 }
  0xb4   : > { %v545_v29 = vrot.slane %v544_v26, 1 }
  0xb5   : > { %v536_v30 = vadd.f32 %v535_v27, %v534_v25  ;;  %v577_v25 = vld [vmem:[#allocation12 + $0x98] sm:$0xff] }
  0xb6   : > { %v546_v31 = vadd.f32 %v545_v29, %v544_v26 }
  0xb7   : > { %v537_v32 = vmul.f32 0.00390625, %v536_v30 }
  0xb8   : > { %v547_v33 = vmul.f32 0.00390625, %v546_v31  ;;  %v578_v31 = vld [vmem:[#allocation12 + $0xa0] sm:$0xff] }
  0xb9   : > { %v548_v34 = vmul.f32 %v537_v32, %v537_v32 }
  0xbb   : > { %v549_v36 = vsub.f32 %v547_v33, %v548_v34 }
  0xbd   : > { %v550_v37 = vmax.f32 %v549_v36, 0.0 }
  0xbf   : > { %v552_v38 = vadd.f32 1e-05, %v550_v37 }
  0xc1   : > { %996 = vrsqrt.f32 %v552_v38 }
  0xce   : > { %v997_v44 = vpop.eup %996 }
  0xcf   : > { %v554_v45 = vmul.f32 %v997_v44, %v551_v41  ;;  %v581_v44 = vld [vmem:[#allocation12 + $0xb8] sm:$0xff] }
  0xd1   : > { %v556_v52 = vmul.f32 %v554_v45, %v537_v32  ;;  %v1551_v53 = vrot.slane %v554_v45, %v593_v43  ;;  %v579_v32 = vld [vmem:[#allocation12 + $0xa8] sm:$0xff]  ;;  %v582_v45 = vld [vmem:[#allocation12 + $0xc0] sm:$0xff] }
  0xd3   : > { %v557_v0 = vsub.f32 %v555_v46, %v556_v52  ;;  %v596_v5 = vmul.f32 %v1551_v53, %v558_v47  ;;  %v597_v6 = vmul.f32 %v1551_v53, %v559_v48  ;;  %v598_v7 = vmul.f32 %v1551_v53, %v560_v49  ;;  %v585_v52 = vld [vmem:[#allocation12 + $0xd8] sm:$0xff] }
  0xd4   : > { %v599_v59 = vmul.f32 %v1551_v53, %v561_v50  ;;  %v600_v11 = vmul.f32 %v1551_v53, %v562_v51  ;;  %v601_v13 = vmul.f32 %v1551_v53, %v563_v54  ;;  %v602_v14 = vmul.f32 %v1551_v53, %v564_v55  ;;  %v583_v50 = vld [vmem:[#allocation12 + $0xc8] sm:$0xff]  ;;  %v584_v51 = vld [vmem:[#allocation12 + $0xd0] sm:$0xff] }
  0xd5   : > { %v1560_v15 = vrot.slane %v557_v0, %v593_v43  ;;  %v603_v16 = vmul.f32 %v1551_v53, %v565_v56  ;;  %v604_v17 = vmul.f32 %v1551_v53, %v566_v57  ;;  %v605_v18 = vmul.f32 %v1551_v53, %v567_v58  ;;  %v580_v43 = vld [vmem:[#allocation12 + $0xb0] sm:$0xff]  ;;  %v586_v58 = vld [vmem:[#allocation12 + $0xe0] sm:$0xff] }
  0xd6   : > { %v606_v20 = vmul.f32 %v1551_v53, %v568_v60  ;;  %v607_v21 = vmul.f32 %v1551_v53, %v569_v8  ;;  %v608_v22 = vmul.f32 %v1551_v53, %v570_v9  ;;  %v609_v23 = vmul.f32 %v1551_v53, %v571_v10  ;;  %v587_v60 = vld [vmem:[#allocation12 + $0xe8] sm:$0xff] }
  0xd7   : > { %v634_v24 = vadd.f32 %v1560_v15, %v596_v5  ;;  %v635_v1 = vadd.f32 %v1560_v15, %v597_v6  ;;  %v636_v2 = vadd.f32 %v1560_v15, %v598_v7  ;;  %v637_v3 = vadd.f32 %v1560_v15, %v599_v59 }
  0xd8   : > { %v638_v28 = vadd.f32 %v1560_v15, %v600_v11  ;;  %v639_v35 = vadd.f32 %v1560_v15, %v601_v13  ;;  %v640_v42 = vadd.f32 %v1560_v15, %v602_v14  ;;  %v641_v61 = vadd.f32 %v1560_v15, %v603_v16  ;;  %v588_v11 = vld [vmem:[#allocation12 + $0xf0] sm:$0xff]  ;;  %v589_v13 = vld [vmem:[#allocation12 + $0xf8] sm:$0xff] }
  0xd9   : > { %666 = vst [vmem:[#allocation12] sm:$0xff] %v634_v24  ;;  %667 = vst [vmem:[#allocation12 + $0x8] sm:$0xff] %v635_v1  ;;  %v642_v26 = vadd.f32 %v1560_v15, %v604_v17  ;;  %v643_v27 = vadd.f32 %v1560_v15, %v605_v18  ;;  %v644_v29 = vadd.f32 %v1560_v15, %v606_v20 }
  0xda   : > { %668 = vst [vmem:[#allocation12 + $0x10] sm:$0xff] %v636_v2  ;;  %669 = vst [vmem:[#allocation12 + $0x18] sm:$0xff] %v637_v3  ;;  %v645_v30 = vadd.f32 %v1560_v15, %v607_v21  ;;  %v646_v33 = vadd.f32 %v1560_v15, %v608_v22  ;;  %v647_v34 = vadd.f32 %v1560_v15, %v609_v23 }
  0xdb   : > { %670 = vst [vmem:[#allocation12 + $0x20] sm:$0xff] %v638_v28  ;;  %671 = vst [vmem:[#allocation12 + $0x28] sm:$0xff] %v639_v35  ;;  %v610_v36 = vmul.f32 %v1551_v53, %v572_v4  ;;  %v611_v37 = vmul.f32 %v1551_v53, %v573_v12  ;;  %v612_v38 = vmul.f32 %v1551_v53, %v574_v19 }
  0xdc   : > { %672 = vst [vmem:[#allocation12 + $0x30] sm:$0xff] %v640_v42  ;;  %673 = vst [vmem:[#allocation12 + $0x38] sm:$0xff] %v641_v61  ;;  %v613_v39 = vmul.f32 %v1551_v53, %v575_v62  ;;  %v614_v40 = vmul.f32 %v1551_v53, %v576_v63  ;;  %v615_v41 = vmul.f32 %v1551_v53, %v577_v25 }
  0xdd   : > { %674 = vst [vmem:[#allocation12 + $0x40] sm:$0xff] %v642_v26  ;;  %675 = vst [vmem:[#allocation12 + $0x48] sm:$0xff] %v643_v27  ;;  %v648_v46 = vadd.f32 %v1560_v15, %v610_v36  ;;  %v649_v47 = vadd.f32 %v1560_v15, %v611_v37  ;;  %v616_v48 = vmul.f32 %v1551_v53, %v578_v31 }
  0xde   : > { %676 = vst [vmem:[#allocation12 + $0x50] sm:$0xff] %v644_v29  ;;  %677 = vst [vmem:[#allocation12 + $0x58] sm:$0xff] %v645_v30  ;;  %v617_v49 = vmul.f32 %v1551_v53, %v579_v32  ;;  %v650_v54 = vadd.f32 %v1560_v15, %v612_v38  ;;  %v651_v55 = vadd.f32 %v1560_v15, %v613_v39 }
  0xdf   : > { %678 = vst [vmem:[#allocation12 + $0x60] sm:$0xff] %v646_v33  ;;  %679 = vst [vmem:[#allocation12 + $0x68] sm:$0xff] %v647_v34  ;;  %v652_v56 = vadd.f32 %v1560_v15, %v614_v40  ;;  %v653_v57 = vadd.f32 %v1560_v15, %v615_v41  ;;  %v654_v0 = vadd.f32 %v1560_v15, %v616_v48 }
  0xe0   : > { %680 = vst [vmem:[#allocation12 + $0x70] sm:$0xff] %v648_v46  ;;  %681 = vst [vmem:[#allocation12 + $0x78] sm:$0xff] %v649_v47  ;;  %v655_v5 = vadd.f32 %v1560_v15, %v617_v49  ;;  %v618_v6 = vmul.f32 %v1551_v53, %v580_v43  ;;  %v619_v7 = vmul.f32 %v1551_v53, %v581_v44 }
  0xe1   : > { %682 = vst [vmem:[#allocation12 + $0x80] sm:$0xff] %v650_v54  ;;  %683 = vst [vmem:[#allocation12 + $0x88] sm:$0xff] %v651_v55  ;;  %v620_v8 = vmul.f32 %v1551_v53, %v582_v45  ;;  %v621_v9 = vmul.f32 %v1551_v53, %v583_v50  ;;  %v622_v10 = vmul.f32 %v1551_v53, %v584_v51 }
  0xe2   : > { %684 = vst [vmem:[#allocation12 + $0x90] sm:$0xff] %v652_v56  ;;  %685 = vst [vmem:[#allocation12 + $0x98] sm:$0xff] %v653_v57  ;;  %v623_v59 = vmul.f32 %v1551_v53, %v585_v52  ;;  %v656_v14 = vadd.f32 %v1560_v15, %v618_v6  ;;  %v657_v16 = vadd.f32 %v1560_v15, %v619_v7 }
  0xe3   : > { %686 = vst [vmem:[#allocation12 + $0xa0] sm:$0xff] %v654_v0  ;;  %687 = vst [vmem:[#allocation12 + $0xa8] sm:$0xff] %v655_v5  ;;  %v624_v17 = vmul.f32 %v1551_v53, %v586_v58  ;;  %v625_v18 = vmul.f32 %v1551_v53, %v587_v60  ;;  %v658_v20 = vadd.f32 %v1560_v15, %v620_v8 }
  0xe4   : > { %v659_v21 = vadd.f32 %v1560_v15, %v621_v9  ;;  %v660_v22 = vadd.f32 %v1560_v15, %v622_v10  ;;  %v661_v23 = vadd.f32 %v1560_v15, %v623_v59  ;;  %688 = vst [vmem:[#allocation12 + $0xb0] sm:$0xff] %v656_v14  ;;  %689 = vst [vmem:[#allocation12 + $0xb8] sm:$0xff] %v657_v16 }
  0xe5   : > { %v662_v24 = vadd.f32 %v1560_v15, %v624_v17  ;;  %v663_v1 = vadd.f32 %v1560_v15, %v625_v18  ;;  %v626_v2 = vmul.f32 %v1551_v53, %v588_v11  ;;  %v627_v3 = vmul.f32 %v1551_v53, %v589_v13  ;;  %690 = vst [vmem:[#allocation12 + $0xc0] sm:$0xff] %v658_v20 }
  0xe6   : > { %691 = vst [vmem:[#allocation12 + $0xc8] sm:$0xff] %v659_v21  ;;  %692 = vst [vmem:[#allocation12 + $0xd0] sm:$0xff] %v660_v22 }
  0xe7   : > { %693 = vst [vmem:[#allocation12 + $0xd8] sm:$0xff] %v661_v23  ;;  %694 = vst [vmem:[#allocation12 + $0xe0] sm:$0xff] %v662_v24  ;;  %v664_v4 = vadd.f32 %v1560_v15, %v626_v2  ;;  %v665_v12 = vadd.f32 %v1560_v15, %v627_v3 }
  0xe8   : > { %695 = vst [vmem:[#allocation12 + $0xe8] sm:$0xff] %v663_v1 }
  0xe9   : > { %696 = vst [vmem:[#allocation12 + $0xf0] sm:$0xff] %v664_v4  ;;  %697 = vst [vmem:[#allocation12 + $0xf8] sm:$0xff] %v665_v12 }
  0xea PF: > { %p915_p11 = scmp.eq.s32.totalorder %s1250_s22, 1  ;;  %s1198_s7 = smov [#allocation12]  }
  0xeb   : > { %s704_s23 = sshll.u32 %s1198_s7, 4  ;;  %s705_s23 = int_to_ptr.vmem [resolvable:$true] %s704_s23 }
  0xec   : > { %s1080_s24 = scalar_lea.vmem %s705_s23, 4096  ;;  %p1087_p7 = scmp.lt.s32.totalorder %s705_s23, %s705_s23 }
  0xed   : > { %p1081_p12 = scmp.ne.s32.totalorder %s705_s23, %s1080_s24  ;;  %p1088_p1 = scmp.lt.s32.totalorder %s1080_s24, %s1080_s24 }
  0xef   : > { %p1082_p8 = pnand %p1081_p12, %p915_p11  ;;  %p1089_p4 = por %p1088_p1, %p1087_p7 }
  0xf1   : > { %p1083_p2 = pneg %p1082_p8 }
  0xf3   : > { %p1090_p3 = pnand %p1089_p4, %p1083_p2 }
  0xf5   : > { %1093 = shalt.err (!%p1090_p3)
}
  0xf6   : > { %s1199_s8 = smov 128   ;;  %s1200_s17 = smov 8  }
  0xf7   : > { %898 = dma.vmem_to_hbm [thread:$0]  (%p915_p11), %s705_s23, 4096, %s1649_s5, [#allocation8], %s1199_s8, %s1199_s8, %s1200_s17  }
  0xf8   : > { %1153 = dma.done.wait (%p915_p11), [#allocation8], 4096  }
  0xf9   : > { %1155 = vsyncadd (%p915_p11), [#allocation8], 4294963200 }
  0xfa PF: > { %p19_p0 = scmp.ge.s32.totalorder %s1276_s28, 4   ;;  %s1664_s18 = smov %s1162_s19 }
  0xfb   : > { %s1665_s19 = smov %s1166_s20  ;;  %s1666_s20 = smov %s1296_s11 }
  0xfc   : > { %s1667_s21 = smov %s1276_s28  ;;  %21 = sbr.rel (!%p19_p0) target bundleno = 6 (0x6), region = 132 }
 0x101   :  { %720 = vsyncpa [#allocation7], 1 }
 0x102   :  { %722 = vsyncpa [#allocation7 + $0x1], 1 }
 0x103   :  { %723 = vsyncpa [#allocation10], 1 }
 0x104   :  { %725 = vsyncpa [#allocation10 + $0x1], 1 }
 0x105   :  { %726 = vsyncpa [#allocation8], 1 }
 0x106   :  { %728 = vsyncpa [#allocation8 + $0x1], 1 }

</bundles_post_ra>
